<compile_context>
chip_gen: v5e
topology: v5e:2x2
jax: 0.10.0
libtpu: 0.0.40
codegen_flags: <defaults>
</compile_context>

<pallas_src>
import jax
import jax.numpy as jnp
from jax.experimental import pallas as pl
from jax.experimental.pallas import tpu as pltpu


def _round_up(x, m):
    return (x + m - 1) // m * m


def _softplus(x):
    # Numerically stable softplus = max(x,0) + log1p(exp(-|x|)); matches
    # torch.nn.functional.softplus (beta=1) to within its threshold=20 cutoff.
    return jnp.maximum(x, 0.0) + jnp.log1p(jnp.exp(-jnp.abs(x)))


def actor_kernel(state_ref, w1_ref, b1_ref, w2_ref, b2_ref, w3_ref, b3_ref,
                 amean_ref, ahalf_ref, out_ref):
    x = state_ref[...].astype(jnp.bfloat16)                                  # [TB, S_pad]
    h1 = _softplus(jnp.dot(x, w1_ref[...],
                           preferred_element_type=jnp.float32) + b1_ref[...])   # [TB, 512]
    h2 = _softplus(jnp.dot(h1.astype(jnp.bfloat16), w2_ref[...],
                           preferred_element_type=jnp.float32) + b2_ref[...])   # [TB, 384]
    z = jnp.dot(h2.astype(jnp.bfloat16), w3_ref[...],
                preferred_element_type=jnp.float32) + b3_ref[...]               # [TB, A_pad]
    out_ref[...] = amean_ref[...] + ahalf_ref[...] * jnp.tanh(z)


def actor_forward(state, kparams, *, batch_tile=256):
    """Fused actor forward. state: [B, num_state] f32 -> [B, act_dim] f32."""
    B, S = state.shape
    act_dim = int(kparams["act_dim"])
    S_pad = kparams["w1"].shape[0]
    A_pad = kparams["w3"].shape[1]

    # Batch tile: big enough to keep the MXU busy for large replay batches,
    # shrunk (to a sublane multiple) for tiny rollout batches so we don't pad
    # a B=2 call up to 256 rows of dead compute.
    tb = min(batch_tile, max(8, _round_up(B, 8)))
    B_pad = _round_up(B, tb)

    x = jnp.zeros((B_pad, S_pad), jnp.float32).at[:B, :S].set(
        state.astype(jnp.float32))

    weights = (kparams["w1"], kparams["b1"], kparams["w2"], kparams["b2"],
               kparams["w3"], kparams["b3"], kparams["amean"], kparams["ahalf"])

    # Whole-array blocks with a constant index_map: fetched once, VMEM-resident
    # across every batch tile of the grid.
    def resident(a):
        return pl.BlockSpec(a.shape, lambda i: (0,) * a.ndim)

    out = pl.pallas_call(
        actor_kernel,
        out_shape=jax.ShapeDtypeStruct((B_pad, A_pad), jnp.float32),
        grid=(B_pad // tb,),
        in_specs=[pl.BlockSpec((tb, S_pad), lambda i: (i, 0))]
                 + [resident(a) for a in weights],
        out_specs=pl.BlockSpec((tb, A_pad), lambda i: (i, 0)),
        compiler_params=pltpu.CompilerParams(
            dimension_semantics=("parallel",)),
    )(x, *weights)

    return out[:B, :act_dim]


def init_params(key, num_state, action_low, action_high):
    """f32 reference parameters matching the PyTorch module's init."""
    action_low = jnp.asarray(action_low, jnp.float32)
    action_high = jnp.asarray(action_high, jnp.float32)
    act_dim = action_low.shape[0]

    k1, k2, k3, k4, k5, k6 = jax.random.split(key, 6)

    def layer_init(kw, kb, fan_in, fan_out):
        # util.layer_init: fan-in uniform bound (standard DDPG init).
        bound = 1.0 / float(fan_in) ** 0.5
        w = jax.random.uniform(kw, (fan_in, fan_out), jnp.float32, -bound, bound)
        b = jax.random.uniform(kb, (1, fan_out), jnp.float32, -bound, bound)
        return w, b

    w1, b1 = layer_init(k1, k2, num_state, 400)
    w2, b2 = layer_init(k3, k4, 400, 300)
    # util.actor_last_layer_init: small uniform (-3e-3, 3e-3).
    w3 = jax.random.uniform(k5, (300, act_dim), jnp.float32, -3e-3, 3e-3)
    b3 = jax.random.uniform(k6, (1, act_dim), jnp.float32, -3e-3, 3e-3)

    return {
        "w1": w1, "b1": b1, "w2": w2, "b2": b2, "w3": w3, "b3": b3,
        "action_mean": (0.5 * (action_high + action_low)).reshape(1, act_dim),
        "action_halfwidth": (0.5 * (action_high - action_low)).reshape(1, act_dim),
        "num_state": int(num_state), "act_dim": int(act_dim),
    }


def pack_params(params):
    """Zero-pad to lane multiples of 128 and cast weights to bf16 for the kernel."""
    num_state = params["num_state"]
    act_dim = params["act_dim"]
    S_pad = _round_up(num_state, 128)
    H1 = _round_up(400, 128)   # 512
    H2 = _round_up(300, 128)   # 384
    A_pad = _round_up(act_dim, 128)

    w1 = jnp.zeros((S_pad, H1), jnp.bfloat16).at[:num_state, :400].set(
        params["w1"].astype(jnp.bfloat16))
    b1 = jnp.zeros((1, H1), jnp.float32).at[:, :400].set(params["b1"])
    w2 = jnp.zeros((H1, H2), jnp.bfloat16).at[:400, :300].set(
        params["w2"].astype(jnp.bfloat16))
    b2 = jnp.zeros((1, H2), jnp.float32).at[:, :300].set(params["b2"])
    w3 = jnp.zeros((H2, A_pad), jnp.bfloat16).at[:300, :act_dim].set(
        params["w3"].astype(jnp.bfloat16))
    b3 = jnp.zeros((1, A_pad), jnp.float32).at[:, :act_dim].set(params["b3"])
    amean = jnp.zeros((1, A_pad), jnp.float32).at[:, :act_dim].set(
        params["action_mean"])
    ahalf = jnp.zeros((1, A_pad), jnp.float32).at[:, :act_dim].set(
        params["action_halfwidth"])

    return {"w1": w1, "b1": b1, "w2": w2, "b2": b2, "w3": w3, "b3": b3,
            "amean": amean, "ahalf": ahalf, "act_dim": act_dim}


def actor_reference(state, params):
    """Pure-JAX f32 reference of the PyTorch forward (for verification)."""
    h = _softplus(state @ params["w1"] + params["b1"])
    h = _softplus(h @ params["w2"] + params["b2"])
    z = h @ params["w3"] + params["b3"]
    return params["action_mean"] + params["action_halfwidth"] * jnp.tanh(z)


if __name__ == "__main__":
    key = jax.random.PRNGKey(0)
    k_state, k_params = jax.random.split(key)

    batch = 2
    num_state = 8          # low-dimensional observation vector
    action_low = -2.0 * jnp.ones((4,), jnp.float32)
    action_high = 2.0 * jnp.ones((4,), jnp.float32)

    params = init_params(k_params, num_state, action_low, action_high)
    kparams = pack_params(params)
    state = jax.random.normal(k_state, (batch, num_state), jnp.float32)

    action = actor_forward(state, kparams)
    jax.block_until_ready(action)

    assert action.shape == (batch, 4)
    assert action.dtype == jnp.float32
    # actions must lie inside [low, high] since they are tanh-squashed + rescaled
    assert bool(jnp.all(action <= action_high + 1e-5))
    assert bool(jnp.all(action >= action_low - 1e-5))

    # Check against the f32 reference (bf16 weights => loose tolerance).
    ref = actor_reference(state, params)
    max_err = float(jnp.max(jnp.abs(action - ref)))
    assert max_err < 0.1, f"max abs error vs f32 reference: {max_err}"

    print("KERNEL_OK")
</pallas_src>

<mosaic_0001>
module attributes {stable_mosaic.version = 11 : i64} {
  func.func @actor_kernel(%arg0: i32, %arg1: memref<8x128xf32, #tpu.memory_space<vmem>>, %arg2: memref<128x512xbf16, #tpu.memory_space<vmem>>, %arg3: memref<1x512xf32, #tpu.memory_space<vmem>>, %arg4: memref<512x384xbf16, #tpu.memory_space<vmem>>, %arg5: memref<1x384xf32, #tpu.memory_space<vmem>>, %arg6: memref<384x128xbf16, #tpu.memory_space<vmem>>, %arg7: memref<1x128xf32, #tpu.memory_space<vmem>>, %arg8: memref<1x128xf32, #tpu.memory_space<vmem>>, %arg9: memref<1x128xf32, #tpu.memory_space<vmem>>, %arg10: memref<8x128xf32, #tpu.memory_space<vmem>>) attributes {dimension_semantics = [#tpu.dimension_semantics<parallel>], iteration_bounds = array<i64: 1>, scalar_prefetch = 0 : i64, scratch_operands = 0 : i64, tpu.core_type = #tpu.core_type<tc>, window_params = [{transform_indices = @transform_0, window_bounds = array<i64: 8, 128>}, {pipeline_mode = #tpu.pipeline_mode<synchronous>, transform_indices = @transform_1, window_bounds = array<i64: 128, 512>}, {pipeline_mode = #tpu.pipeline_mode<synchronous>, transform_indices = @transform_2, window_bounds = array<i64: 1, 512>}, {pipeline_mode = #tpu.pipeline_mode<synchronous>, transform_indices = @transform_3, window_bounds = array<i64: 512, 384>}, {pipeline_mode = #tpu.pipeline_mode<synchronous>, transform_indices = @transform_4, window_bounds = array<i64: 1, 384>}, {pipeline_mode = #tpu.pipeline_mode<synchronous>, transform_indices = @transform_5, window_bounds = array<i64: 384, 128>}, {pipeline_mode = #tpu.pipeline_mode<synchronous>, transform_indices = @transform_6, window_bounds = array<i64: 1, 128>}, {pipeline_mode = #tpu.pipeline_mode<synchronous>, transform_indices = @transform_7, window_bounds = array<i64: 1, 128>}, {pipeline_mode = #tpu.pipeline_mode<synchronous>, transform_indices = @transform_8, window_bounds = array<i64: 1, 128>}, {transform_indices = @transform_9, window_bounds = array<i64: 8, 128>}]} {
    %c0 = arith.constant 0 : index
    %c0_0 = arith.constant 0 : index
    %0 = vector.load %arg1[%c0, %c0_0] : memref<8x128xf32, #tpu.memory_space<vmem>>, vector<8x128xf32>
    %1 = arith.truncf %0 : vector<8x128xf32> to vector<8x128xbf16>
    %c0_1 = arith.constant 0 : index
    %c0_2 = arith.constant 0 : index
    %2 = vector.load %arg2[%c0_1, %c0_2] : memref<128x512xbf16, #tpu.memory_space<vmem>>, vector<128x512xbf16>
    %cst = arith.constant dense<0.000000e+00> : vector<8x512xf32>
    %3 = tpu.matmul %1, %2, %cst {dimension_numbers = #tpu.dot_dimension_numbers<[1], [0], [0], [1], [0, 0, 1, 1], [], []>} : vector<8x128xbf16>, vector<128x512xbf16>, vector<8x512xf32> -> vector<8x512xf32>
    %c0_3 = arith.constant 0 : index
    %c0_4 = arith.constant 0 : index
    %4 = vector.load %arg3[%c0_3, %c0_4] : memref<1x512xf32, #tpu.memory_space<vmem>>, vector<1x512xf32>
    %5 = vector.broadcast %4 : vector<1x512xf32> to vector<8x512xf32>
    %6 = arith.addf %3, %5 : vector<8x512xf32>
    %cst_5 = arith.constant 0.000000e+00 : f32
    %7 = vector.broadcast %cst_5 : f32 to vector<8x512xf32>
    %8 = arith.maximumf %6, %7 : vector<8x512xf32>
    %9 = math.absf %6 : vector<8x512xf32>
    %cst_6 = arith.constant 0.000000e+00 : f32
    %10 = vector.broadcast %cst_6 : f32 to vector<8x512xf32>
    %11 = arith.subf %10, %9 : vector<8x512xf32>
    %12 = math.exp %11 : vector<8x512xf32>
    %13 = math.log1p %12 : vector<8x512xf32>
    %14 = arith.addf %8, %13 : vector<8x512xf32>
    %15 = arith.truncf %14 : vector<8x512xf32> to vector<8x512xbf16>
    %c0_7 = arith.constant 0 : index
    %c0_8 = arith.constant 0 : index
    %16 = vector.load %arg4[%c0_7, %c0_8] : memref<512x384xbf16, #tpu.memory_space<vmem>>, vector<512x384xbf16>
    %cst_9 = arith.constant dense<0.000000e+00> : vector<8x384xf32>
    %17 = tpu.matmul %15, %16, %cst_9 {dimension_numbers = #tpu.dot_dimension_numbers<[1], [0], [0], [1], [0, 0, 1, 1], [], []>} : vector<8x512xbf16>, vector<512x384xbf16>, vector<8x384xf32> -> vector<8x384xf32>
    %c0_10 = arith.constant 0 : index
    %c0_11 = arith.constant 0 : index
    %18 = vector.load %arg5[%c0_10, %c0_11] : memref<1x384xf32, #tpu.memory_space<vmem>>, vector<1x384xf32>
    %19 = vector.broadcast %18 : vector<1x384xf32> to vector<8x384xf32>
    %20 = arith.addf %17, %19 : vector<8x384xf32>
    %cst_12 = arith.constant 0.000000e+00 : f32
    %21 = vector.broadcast %cst_12 : f32 to vector<8x384xf32>
    %22 = arith.maximumf %20, %21 : vector<8x384xf32>
    %23 = math.absf %20 : vector<8x384xf32>
    %cst_13 = arith.constant 0.000000e+00 : f32
    %24 = vector.broadcast %cst_13 : f32 to vector<8x384xf32>
    %25 = arith.subf %24, %23 : vector<8x384xf32>
    %26 = math.exp %25 : vector<8x384xf32>
    %27 = math.log1p %26 : vector<8x384xf32>
    %28 = arith.addf %22, %27 : vector<8x384xf32>
    %29 = arith.truncf %28 : vector<8x384xf32> to vector<8x384xbf16>
    %c0_14 = arith.constant 0 : index
    %c0_15 = arith.constant 0 : index
    %30 = vector.load %arg6[%c0_14, %c0_15] : memref<384x128xbf16, #tpu.memory_space<vmem>>, vector<384x128xbf16>
    %cst_16 = arith.constant dense<0.000000e+00> : vector<8x128xf32>
    %31 = tpu.matmul %29, %30, %cst_16 {dimension_numbers = #tpu.dot_dimension_numbers<[1], [0], [0], [1], [0, 0, 1, 1], [], []>} : vector<8x384xbf16>, vector<384x128xbf16>, vector<8x128xf32> -> vector<8x128xf32>
    %c0_17 = arith.constant 0 : index
    %c0_18 = arith.constant 0 : index
    %32 = vector.load %arg7[%c0_17, %c0_18] : memref<1x128xf32, #tpu.memory_space<vmem>>, vector<1x128xf32>
    %33 = vector.broadcast %32 : vector<1x128xf32> to vector<8x128xf32>
    %34 = arith.addf %31, %33 : vector<8x128xf32>
    %c0_19 = arith.constant 0 : index
    %c0_20 = arith.constant 0 : index
    %35 = vector.load %arg8[%c0_19, %c0_20] : memref<1x128xf32, #tpu.memory_space<vmem>>, vector<1x128xf32>
    %c0_21 = arith.constant 0 : index
    %c0_22 = arith.constant 0 : index
    %36 = vector.load %arg9[%c0_21, %c0_22] : memref<1x128xf32, #tpu.memory_space<vmem>>, vector<1x128xf32>
    %37 = math.tanh %34 : vector<8x128xf32>
    %38 = vector.broadcast %36 : vector<1x128xf32> to vector<8x128xf32>
    %39 = arith.mulf %38, %37 : vector<8x128xf32>
    %40 = vector.broadcast %35 : vector<1x128xf32> to vector<8x128xf32>
    %41 = arith.addf %40, %39 : vector<8x128xf32>
    %c0_23 = arith.constant 0 : index
    %c0_24 = arith.constant 0 : index
    %42 = vector.load %arg10[%c0_23, %c0_24] : memref<8x128xf32, #tpu.memory_space<vmem>>, vector<8x128xf32>
    tpu.vector_store %arg10[%c0_23, %c0_24], %41 {strides = array<i32>} : memref<8x128xf32, #tpu.memory_space<vmem>>, vector<8x128xf32>,
    return
  }
  func.func @transform_0(%arg0: i32) -> (i32, i32) {
    %c0_i32 = arith.constant 0 : i32
    %c0_i32_0 = arith.constant 0 : i32
    return %arg0, %c0_i32 : i32, i32
  }
  func.func @transform_1(%arg0: i32) -> (i32, i32) {
    %c0_i32 = arith.constant 0 : i32
    %c0_i32_0 = arith.constant 0 : i32
    %c0_i32_1 = arith.constant 0 : i32
    return %c0_i32, %c0_i32_0 : i32, i32
  }
  func.func @transform_2(%arg0: i32) -> (i32, i32) {
    %c0_i32 = arith.constant 0 : i32
    %c0_i32_0 = arith.constant 0 : i32
    %c0_i32_1 = arith.constant 0 : i32
    return %c0_i32, %c0_i32_0 : i32, i32
  }
  func.func @transform_3(%arg0: i32) -> (i32, i32) {
    %c0_i32 = arith.constant 0 : i32
    %c0_i32_0 = arith.constant 0 : i32
    %c0_i32_1 = arith.constant 0 : i32
    return %c0_i32, %c0_i32_0 : i32, i32
  }
  func.func @transform_4(%arg0: i32) -> (i32, i32) {
    %c0_i32 = arith.constant 0 : i32
    %c0_i32_0 = arith.constant 0 : i32
    %c0_i32_1 = arith.constant 0 : i32
    return %c0_i32, %c0_i32_0 : i32, i32
  }
  func.func @transform_5(%arg0: i32) -> (i32, i32) {
    %c0_i32 = arith.constant 0 : i32
    %c0_i32_0 = arith.constant 0 : i32
    %c0_i32_1 = arith.constant 0 : i32
    return %c0_i32, %c0_i32_0 : i32, i32
  }
  func.func @transform_6(%arg0: i32) -> (i32, i32) {
    %c0_i32 = arith.constant 0 : i32
    %c0_i32_0 = arith.constant 0 : i32
    %c0_i32_1 = arith.constant 0 : i32
    return %c0_i32, %c0_i32_0 : i32, i32
  }
  func.func @transform_7(%arg0: i32) -> (i32, i32) {
    %c0_i32 = arith.constant 0 : i32
    %c0_i32_0 = arith.constant 0 : i32
    %c0_i32_1 = arith.constant 0 : i32
    return %c0_i32, %c0_i32_0 : i32, i32
  }
  func.func @transform_8(%arg0: i32) -> (i32, i32) {
    %c0_i32 = arith.constant 0 : i32
    %c0_i32_0 = arith.constant 0 : i32
    %c0_i32_1 = arith.constant 0 : i32
    return %c0_i32, %c0_i32_0 : i32, i32
  }
  func.func @transform_9(%arg0: i32) -> (i32, i32) {
    %c0_i32 = arith.constant 0 : i32
    %c0_i32_0 = arith.constant 0 : i32
    return %arg0, %c0_i32 : i32, i32
  }
}

</mosaic_0001>

<bundles_post_ra>
// kernel: tpu_custom_call.1
= control target key start
LH: loop header
LB: loop body
LE: loop exit
PB: predicated region body
PF: predicated region fallthrough
CT: control target
= control target key end

     0   :  { %14 = vsyncpa [#allocation3], 0  ;;  %s2645_s0 = inlined_call_operand.hbm [shape: f32[8,128], index: 0, kind: input, shape index: {}]   ;;  %s2646_s1 = inlined_call_operand.hbm [shape: bf16[128,512], index: 1, kind: input, shape index: {}]   ;;  %s2647_s2 = inlined_call_operand.hbm [shape: f32[1,512], index: 2, kind: input, shape index: {}]   ;;  %s2648_s3 = inlined_call_operand.hbm [shape: bf16[512,384], index: 3, kind: input, shape index: {}]   ;;  %s2649_s4 = inlined_call_operand.vmem [shape: f32[1,384], index: 4, kind: input, shape index: {}]   ;;  %s2650_s5 = inlined_call_operand.hbm [shape: bf16[384,128], index: 5, kind: input, shape index: {}]   ;;  %s2651_s6 = inlined_call_operand.vmem [shape: f32[1,128], index: 6, kind: input, shape index: {}]   ;;  %s2652_s7 = inlined_call_operand.vmem [shape: f32[1,128], index: 7, kind: input, shape index: {}]   ;;  %s2653_s8 = inlined_call_operand.vmem [shape: f32[1,128], index: 8, kind: input, shape index: {}]   ;;  %s2654_s9 = inlined_call_operand.hbm [shape: f32[8,128], index: 9, kind: output, shape index: {}]  }
   0x1   :  { %15 = vsyncpa [#allocation6], 0 }
   0x2   :  { %16 = vsyncpa [#allocation9], 0  ;;  %s33_s11 = sshll.u32 %s2646_s1, 4  ;;  %s34_s11 = int_to_ptr.hbm [resolvable:$true] %s33_s11 }
   0x3   :  { %17 = vsyncpa [#allocation4], 0  ;;  %s2502_s12 = smov [#allocation5]   ;;  %s57_s16 = sshll.u32 %s2648_s3, 4  ;;  %s58_s16 = int_to_ptr.hbm [resolvable:$true] %s57_s16 }
   0x4   :  { %s35_s13 = sshll.u32 %s2502_s12, 4  ;;  %s2503_s17 = smov 256   ;;  %s36_s13 = int_to_ptr.vmem [resolvable:$true] %s35_s13 }
   0x5   :  { %s2504_s18 = smov 16   ;;  %s2505_s19 = smov [#allocation8]  }
   0x6   :  { %41 = dma.hbm_to_vmem [thread:$0]  %s34_s11, 4096, %s36_s13, [#allocation6], %s2503_s17, %s2503_s17, %s2504_s18  }
   0x7   :  { %s59_s20 = sshll.u32 %s2505_s19, 4  ;;  %s2506_s21 = smov 192   ;;  %s60_s20 = int_to_ptr.vmem [resolvable:$true] %s59_s20 }
   0x8   :  { %s2507_s22 = smov 12   ;;  %s23_s24 = sshll.u32 %s2645_s0, 4  ;;  %s24_s24 = int_to_ptr.hbm [resolvable:$true] %s23_s24 }
   0x9   :  { %65 = dma.hbm_to_vmem [thread:$0]  %s58_s16, 12288, %s60_s20, [#allocation9], %s2506_s21, %s2506_s21, %s2507_s22  }
   0xa   :  { %s2508_s25 = smov [#allocation2]   ;;  %s47_s28 = sshll.u32 %s2647_s2, 4  ;;  %s48_s28 = int_to_ptr.hbm [resolvable:$true] %s47_s28 }
   0xb   :  { %s25_s26 = sshll.u32 %s2508_s25, 4  ;;  %s2509_s29 = smov [#allocation7]   ;;  %s26_s26 = int_to_ptr.vmem [resolvable:$true] %s25_s26 }
   0xc   :  { %28 = dma.hbm_to_vmem [thread:$0]  %s24_s24, 128, %s26_s26, [#allocation3]  }
   0xd   :  { %s49_s30 = sshll.u32 %s2509_s29, 4  ;;  %s72_s12 = sshll.u32 %s2650_s5, 4  ;;  %s50_s30 = int_to_ptr.vmem [resolvable:$true] %s49_s30  ;;  %s73_s12 = int_to_ptr.hbm [resolvable:$true] %s72_s12 }
   0xe   :  { %52 = dma.hbm_to_vmem [thread:$0]  %s48_s28, 64, %s50_s30, [#allocation6]  }
   0xf   :  { %s2510_s0 = smov [#allocation10]   ;;  %s2511_s14 = smov 64  }
  0x10   :  { %s74_s13 = sshll.u32 %s2510_s0, 4  ;;  %s2512_s15 = smov 4   ;;  %s75_s13 = int_to_ptr.vmem [resolvable:$true] %s74_s13 }
  0x11   :  { %80 = dma.hbm_to_vmem [thread:$0]  %s73_s12, 3072, %s75_s13, [#allocation9], %s2511_s14, %s2511_s14, %s2512_s15  }
  0x12   :  { %2494 = dma.done.wait [#allocation3], 128  }
  0x13   :  { %2495 = vsyncadd [#allocation3], 4294967168 }
  0x14   :  { %2496 = dma.done.wait [#allocation6], 4160  }
  0x15   :  { %2497 = vsyncadd [#allocation6], 4294963136 }
  0x16   :  { %2498 = dma.done.wait [#allocation9], 15360  }
  0x17   :  { %2499 = vsyncadd [#allocation9], 4294951936  ;;  %v1659_v0 = vld [vmem:[#allocation5 + $0xe0] sm:$0xf]  ;;  %v2183_v1 = vld [vmem:[#allocation5 + $0xec] sm:$0xf0] }
  0x18   :  { %v2181_v2 = vld [vmem:[#allocation5 + $0xe4] sm:$0xf]  ;;  %v1660_v3 = vor.u32 %v2183_v1, %v1659_v0  ;;  %v1661_v4 = vld [vmem:[#allocation5 + $0xf0] sm:$0xf0]  ;;  %v1667_v5 = vld [vmem:[#allocation5 + $0xe8] sm:$0xf] }
  0x19   :  { %v2184_v6 = vld [vmem:[#allocation5 + $0xf4] sm:$0xf0]  ;;  %v1664_v7 = vor.u32 %v2181_v2, %v1661_v4  ;;  %v2182_v9 = vld [vmem:[#allocation5 + $0xec] sm:$0xf]  ;;  %v1669_v10 = vld [vmem:[#allocation5 + $0xf8] sm:$0xf0] }
  0x1a   :  { %v1668_v8 = vor.u32 %v2184_v6, %v1667_v5  ;;  %v1643_v11 = vld [vmem:[#allocation5 + $0xc0] sm:$0xf]  ;;  %311 = vmatpush.bf16.msra.mxu0 %v1660_v3  ;;  %v1672_v12 = vor.u32 %v2182_v9, %v1669_v10  ;;  %v2179_v13 = vld [vmem:[#allocation5 + $0xcc] sm:$0xf0]  ;;  %v2177_v14 = vld [vmem:[#allocation5 + $0xc4] sm:$0xf] }
  0x1b   :  { %v1645_v15 = vld [vmem:[#allocation5 + $0xd0] sm:$0xf0]  ;;  %324 = vmatpush.bf16.msra.mxu1 %v1664_v7  ;;  %v1644_v16 = vor.u32 %v2179_v13, %v1643_v11  ;;  %v1651_v18 = vld [vmem:[#allocation5 + $0xc8] sm:$0xf]  ;;  %v2180_v19 = vld [vmem:[#allocation5 + $0xd4] sm:$0xf0] }
  0x1c   :  { %337 = vmatpush.bf16.msra.mxu2 %v1668_v8  ;;  %v1648_v17 = vor.u32 %v2177_v14, %v1645_v15  ;;  %v2178_v20 = vld [vmem:[#allocation5 + $0xcc] sm:$0xf]  ;;  %350 = vmatpush.bf16.msra.mxu3 %v1672_v12  ;;  %v1652_v21 = vor.u32 %v2180_v19, %v1651_v18  ;;  %v1653_v22 = vld [vmem:[#allocation5 + $0xd8] sm:$0xf0]  ;;  %v1627_v23 = vld [vmem:[#allocation5 + $0xa0] sm:$0xf] }
  0x1d   :  { %v2175_v24 = vld [vmem:[#allocation5 + $0xac] sm:$0xf0]  ;;  %v1656_v25 = vor.u32 %v2178_v20, %v1653_v22  ;;  %v2173_v26 = vld [vmem:[#allocation5 + $0xa4] sm:$0xf]  ;;  %v1629_v27 = vld [vmem:[#allocation5 + $0xb0] sm:$0xf0] }
  0x1e   :  { %v1635_v28 = vld [vmem:[#allocation5 + $0xa8] sm:$0xf]  ;;  %312 = vmatpush.bf16.msra.mxu0 %v1644_v16  ;;  %v1628_v29 = vor.u32 %v2175_v24, %v1627_v23  ;;  %v2176_v30 = vld [vmem:[#allocation5 + $0xb4] sm:$0xf0]  ;;  %v2174_v31 = vld [vmem:[#allocation5 + $0xac] sm:$0xf]  ;;  %v1632_v33 = vor.u32 %v2173_v26, %v1629_v27 }
  0x1f   :  { %v1637_v32 = vld [vmem:[#allocation5 + $0xb8] sm:$0xf0]  ;;  %325 = vmatpush.bf16.msra.mxu1 %v1648_v17  ;;  %v1636_v34 = vor.u32 %v2176_v30, %v1635_v28  ;;  %v1611_v35 = vld [vmem:[#allocation5 + $0x80] sm:$0xf]  ;;  %v2171_v36 = vld [vmem:[#allocation5 + $0x8c] sm:$0xf0] }
  0x20   :  { %338 = vmatpush.bf16.msra.mxu2 %v1652_v21  ;;  %v2169_v37 = vld [vmem:[#allocation5 + $0x84] sm:$0xf]  ;;  %351 = vmatpush.bf16.msra.mxu3 %v1656_v25  ;;  %v1640_v38 = vor.u32 %v2174_v31, %v1637_v32  ;;  %v1613_v39 = vld [vmem:[#allocation5 + $0x90] sm:$0xf0]  ;;  %v1619_v40 = vld [vmem:[#allocation5 + $0x88] sm:$0xf]  ;;  %v1612_v44 = vor.u32 %v2171_v36, %v1611_v35 }
  0x21   :  { %v2172_v41 = vld [vmem:[#allocation5 + $0x94] sm:$0xf0]  ;;  %v2170_v42 = vld [vmem:[#allocation5 + $0x8c] sm:$0xf]  ;;  %v1621_v43 = vld [vmem:[#allocation5 + $0x98] sm:$0xf0]  ;;  %v1616_v45 = vor.u32 %v2169_v37, %v1613_v39 }
  0x22   :  { %313 = vmatpush.bf16.msra.mxu0 %v1628_v29  ;;  %v1620_v46 = vor.u32 %v2172_v41, %v1619_v40  ;;  %v1595_v47 = vld [vmem:[#allocation5 + $0x60] sm:$0xf]  ;;  %v2167_v48 = vld [vmem:[#allocation5 + $0x6c] sm:$0xf0]  ;;  %v2165_v49 = vld [vmem:[#allocation5 + $0x64] sm:$0xf]  ;;  %v1624_v50 = vor.u32 %v2170_v42, %v1621_v43 }
  0x23   :  { %326 = vmatpush.bf16.msra.mxu1 %v1632_v33  ;;  %v1597_v51 = vld [vmem:[#allocation5 + $0x70] sm:$0xf0]  ;;  %v1603_v52 = vld [vmem:[#allocation5 + $0x68] sm:$0xf]  ;;  %v2168_v53 = vld [vmem:[#allocation5 + $0x74] sm:$0xf0]  ;;  %v1596_v56 = vor.u32 %v2167_v48, %v1595_v47 }
  0x24   :  { %339 = vmatpush.bf16.msra.mxu2 %v1636_v34  ;;  %352 = vmatpush.bf16.msra.mxu3 %v1640_v38  ;;  %v2166_v54 = vld [vmem:[#allocation5 + $0x6c] sm:$0xf]  ;;  %v1605_v55 = vld [vmem:[#allocation5 + $0x78] sm:$0xf0]  ;;  %v1600_v57 = vor.u32 %v2165_v49, %v1597_v51  ;;  %v1604_v58 = vor.u32 %v2168_v53, %v1603_v52  ;;  %v1579_v59 = vld [vmem:[#allocation5 + $0x40] sm:$0xf] }
  0x25   :  { %v2163_v60 = vld [vmem:[#allocation5 + $0x4c] sm:$0xf0]  ;;  %v2161_v61 = vld [vmem:[#allocation5 + $0x44] sm:$0xf]  ;;  %v1608_v62 = vor.u32 %v2166_v54, %v1605_v55  ;;  %v1581_v63 = vld [vmem:[#allocation5 + $0x50] sm:$0xf0] }
  0x26   :  { %314 = vmatpush.bf16.msra.mxu0 %v1612_v44  ;;  %v1587_v0 = vld [vmem:[#allocation5 + $0x48] sm:$0xf]  ;;  %v2164_v1 = vld [vmem:[#allocation5 + $0x54] sm:$0xf0]  ;;  %v2162_v2 = vld [vmem:[#allocation5 + $0x4c] sm:$0xf]  ;;  %v1580_v4 = vor.u32 %v2163_v60, %v1579_v59  ;;  %v1584_v5 = vor.u32 %v2161_v61, %v1581_v63 }
  0x27   :  { %327 = vmatpush.bf16.msra.mxu1 %v1616_v45  ;;  %v1589_v3 = vld [vmem:[#allocation5 + $0x58] sm:$0xf0]  ;;  %v1588_v6 = vor.u32 %v2164_v1, %v1587_v0  ;;  %v1563_v7 = vld [vmem:[#allocation5 + $0x20] sm:$0xf]  ;;  %v2159_v8 = vld [vmem:[#allocation5 + $0x2c] sm:$0xf0] }
  0x28   :  { %340 = vmatpush.bf16.msra.mxu2 %v1620_v46  ;;  %353 = vmatpush.bf16.msra.mxu3 %v1624_v50  ;;  %v2157_v9 = vld [vmem:[#allocation5 + $0x24] sm:$0xf]  ;;  %v1592_v10 = vor.u32 %v2162_v2, %v1589_v3  ;;  %v1565_v11 = vld [vmem:[#allocation5 + $0x30] sm:$0xf0]  ;;  %v1571_v12 = vld [vmem:[#allocation5 + $0x28] sm:$0xf]  ;;  %v1564_v16 = vor.u32 %v2159_v8, %v1563_v7 }
  0x29   :  { %v2160_v13 = vld [vmem:[#allocation5 + $0x34] sm:$0xf0]  ;;  %v2158_v14 = vld [vmem:[#allocation5 + $0x2c] sm:$0xf]  ;;  %v1573_v15 = vld [vmem:[#allocation5 + $0x38] sm:$0xf0]  ;;  %v1568_v18 = vor.u32 %v2157_v9, %v1565_v11 }
  0x2a   :  { %315 = vmatpush.bf16.msra.mxu0 %v1596_v56  ;;  %v1547_v17 = vld [vmem:[#allocation5] sm:$0xf]  ;;  %v1572_v19 = vor.u32 %v2160_v13, %v1571_v12  ;;  %v2155_v20 = vld [vmem:[#allocation5 + $0xc] sm:$0xf0]  ;;  %v2153_v21 = vld [vmem:[#allocation5 + $0x4] sm:$0xf]  ;;  %v1576_v23 = vor.u32 %v2158_v14, %v1573_v15 }
  0x2b   :  { %328 = vmatpush.bf16.msra.mxu1 %v1600_v57  ;;  %v1549_v22 = vld [vmem:[#allocation5 + $0x10] sm:$0xf0]  ;;  %v1555_v24 = vld [vmem:[#allocation5 + $0x8] sm:$0xf]  ;;  %v2156_v25 = vld [vmem:[#allocation5 + $0x14] sm:$0xf0]  ;;  %v1548_v30 = vor.u32 %v2155_v20, %v1547_v17 }
  0x2c   :  { %341 = vmatpush.bf16.msra.mxu2 %v1604_v58  ;;  %354 = vmatpush.bf16.msra.mxu3 %v1608_v62  ;;  %v2154_v26 = vld [vmem:[#allocation5 + $0xc] sm:$0xf]  ;;  %v1557_v27 = vld [vmem:[#allocation5 + $0x18] sm:$0xf0]  ;;  %v2207_v29 = vld [vmem:[#allocation8 + $0xb0] sm:$0xf0]  ;;  %v1552_v34 = vor.u32 %v2153_v21, %v1549_v22  ;;  %v1556_v35 = vor.u32 %v2156_v25, %v1555_v24 }
  0x2d   :  { %v1759_v28 = vld [vmem:[#allocation8 + $0xa8] sm:$0xf]  ;;  %v107_v31 = vld [vmem:[#allocation2] sm:$0xff]  ;;  %v1560_v36 = vor.u32 %v2154_v26, %v1557_v27  ;;  %v1747_v38 = vld [vmem:[#allocation8 + $0x90] sm:$0xf]  ;;  %s2513_s21 = smov [#allocation11]  }
  0x2e   :  { %316 = vmatpush.bf16.msra.mxu0 %v1580_v4  ;;  %v1855_v32 = vld [vmem:[#allocation8 + $0x168] sm:$0xf]  ;;  %v2231_v33 = vld [vmem:[#allocation8 + $0x170] sm:$0xf0]  ;;  %v1760_v37 = vor.u32 %v2207_v29, %v1759_v28  ;;  %v108_v41 = vpack.c.bf16 %v107_v31, %v107_v31  ;;  %v2204_v43 = vld [vmem:[#allocation8 + $0x98] sm:$0xf0] }
  0x2f   :  { %329 = vmatpush.bf16.msra.mxu1 %v1584_v5  ;;  %v1951_v39 = vld [vmem:[#allocation8 + $0x228] sm:$0xf]  ;;  %v2255_v40 = vld [vmem:[#allocation8 + $0x230] sm:$0xf0]  ;;  %v1856_v42 = vor.u32 %v2231_v33, %v1855_v32  ;;  %v1843_v46 = vld [vmem:[#allocation8 + $0x150] sm:$0xf]  ;;  %v1748_v49 = vor.u32 %v2204_v43, %v1747_v38 }
  0x30   :  { %342 = vmatpush.bf16.msra.mxu2 %v1588_v6  ;;  %355 = vmatpush.bf16.msra.mxu3 %v1592_v10  ;;  %v2047_v44 = vld [vmem:[#allocation8 + $0x2e8] sm:$0xf]  ;;  %v2279_v45 = vld [vmem:[#allocation8 + $0x2f0] sm:$0xf0]  ;;  %v2228_v47 = vld [vmem:[#allocation8 + $0x158] sm:$0xf0]  ;;  %v1952_v48 = vor.u32 %v2255_v40, %v1951_v39 }
  0x31   :  { %v2048_v50 = vor.u32 %v2279_v45, %v2047_v44  ;;  %v1735_v51 = vld [vmem:[#allocation8 + $0x78] sm:$0xf]  ;;  %v1939_v52 = vld [vmem:[#allocation8 + $0x210] sm:$0xf]  ;;  %v2252_v53 = vld [vmem:[#allocation8 + $0x218] sm:$0xf0]  ;;  %v1844_v54 = vor.u32 %v2228_v47, %v1843_v46 }
  0x32   :  { %317 = vmatpush.bf16.msra.mxu0 %v1564_v16  ;;  %v2201_v55 = vld [vmem:[#allocation8 + $0x80] sm:$0xf0]  ;;  %v2035_v56 = vld [vmem:[#allocation8 + $0x2d0] sm:$0xf]  ;;  %v2276_v57 = vld [vmem:[#allocation8 + $0x2d8] sm:$0xf0]  ;;  %v1940_v60 = vor.u32 %v2252_v53, %v1939_v52 }
  0x33   :  { %330 = vmatpush.bf16.msra.mxu1 %v1568_v18  ;;  %v1831_v58 = vld [vmem:[#allocation8 + $0x138] sm:$0xf]  ;;  %v2225_v59 = vld [vmem:[#allocation8 + $0x140] sm:$0xf0]  ;;  %v1723_v61 = vld [vmem:[#allocation8 + $0x60] sm:$0xf]  ;;  %v1736_v63 = vor.u32 %v2201_v55, %v1735_v51  ;;  %v2036_v0 = vor.u32 %v2276_v57, %v2035_v56 }
  0x34   :  { %343 = vmatpush.bf16.msra.mxu2 %v1572_v19  ;;  %356 = vmatpush.bf16.msra.mxu3 %v1576_v23  ;;  %v2198_v62 = vld [vmem:[#allocation8 + $0x68] sm:$0xf0]  ;;  %v1927_v1 = vld [vmem:[#allocation8 + $0x1f8] sm:$0xf]  ;;  %v2249_v2 = vld [vmem:[#allocation8 + $0x200] sm:$0xf0]  ;;  %v1832_v4 = vor.u32 %v2225_v59, %v1831_v58 }
  0x35   :  { %v2023_v3 = vld [vmem:[#allocation8 + $0x2b8] sm:$0xf]  ;;  %v2273_v5 = vld [vmem:[#allocation8 + $0x2c0] sm:$0xf0]  ;;  %v1819_v6 = vld [vmem:[#allocation8 + $0x120] sm:$0xf]  ;;  %v1928_v8 = vor.u32 %v2249_v2, %v1927_v1  ;;  %v1724_v9 = vor.u32 %v2198_v62, %v1723_v61 }
  0x36   :  { %318 = vmatpush.bf16.msra.mxu0 %v1548_v30  ;;  %v2222_v7 = vld [vmem:[#allocation8 + $0x128] sm:$0xf0]  ;;  %v2024_v10 = vor.u32 %v2273_v5, %v2023_v3  ;;  %v1711_v11 = vld [vmem:[#allocation8 + $0x48] sm:$0xf]  ;;  %v1915_v12 = vld [vmem:[#allocation8 + $0x1e0] sm:$0xf] }
  0x37   :  { %331 = vmatpush.bf16.msra.mxu1 %v1552_v34  ;;  %v2246_v13 = vld [vmem:[#allocation8 + $0x1e8] sm:$0xf0]  ;;  %v1820_v14 = vor.u32 %v2222_v7, %v1819_v6  ;;  %v2195_v15 = vld [vmem:[#allocation8 + $0x50] sm:$0xf0]  ;;  %v2011_v16 = vld [vmem:[#allocation8 + $0x2a0] sm:$0xf] }
  0x38   :  { %344 = vmatpush.bf16.msra.mxu2 %v1556_v35  ;;  %357 = vmatpush.bf16.msra.mxu3 %v1560_v36  ;;  %v2270_v17 = vld [vmem:[#allocation8 + $0x2a8] sm:$0xf0]  ;;  %v1807_v18 = vld [vmem:[#allocation8 + $0x108] sm:$0xf]  ;;  %v2219_v19 = vld [vmem:[#allocation8 + $0x110] sm:$0xf0]  ;;  %v1916_v20 = vor.u32 %v2246_v13, %v1915_v12  ;;  %v1712_v21 = vor.u32 %v2195_v15, %v1711_v11 }
  0x39   :  { %319 = vmatmul.bf16.vlgmr.msra.gmra.mxu0 %v108_v41  ;;  %v2012_v22 = vor.u32 %v2270_v17, %v2011_v16  ;;  %v1699_v23 = vld [vmem:[#allocation8 + $0x30] sm:$0xf]  ;;  %v1903_v24 = vld [vmem:[#allocation8 + $0x1c8] sm:$0xf]  ;;  %v2243_v25 = vld [vmem:[#allocation8 + $0x1d0] sm:$0xf0]  ;;  %v1808_v26 = vor.u32 %v2219_v19, %v1807_v18 }
  0x3a   :  { %1075 = vmatpush.bf16.msrb.mxu0 %v1760_v37  ;;  %332 = vmatmul.bf16.vlgmr.msra.gmra.mxu1 %v108_v41  ;;  %v2192_v27 = vld [vmem:[#allocation8 + $0x38] sm:$0xf0]  ;;  %v1999_v28 = vld [vmem:[#allocation8 + $0x288] sm:$0xf]  ;;  %v2267_v29 = vld [vmem:[#allocation8 + $0x290] sm:$0xf0]  ;;  %v1904_v32 = vor.u32 %v2243_v25, %v1903_v24 }
  0x3b   :  { %1088 = vmatpush.bf16.msrb.mxu1 %v1856_v42  ;;  %345 = vmatmul.bf16.vlgmr.msra.gmra.mxu2 %v108_v41  ;;  %v1795_v30 = vld [vmem:[#allocation8 + $0xf0] sm:$0xf]  ;;  %v2216_v31 = vld [vmem:[#allocation8 + $0xf8] sm:$0xf0]  ;;  %v1700_v33 = vor.u32 %v2192_v27, %v1699_v23  ;;  %v2000_v34 = vor.u32 %v2267_v29, %v1999_v28  ;;  %v1687_v36 = vld [vmem:[#allocation8 + $0x18] sm:$0xf] }
  0x3c   :  { %358 = vmatmul.bf16.vlgmr.msra.gmra.mxu3 %v108_v41  ;;  %1101 = vmatpush.bf16.msrb.mxu2 %v1952_v48  ;;  %v1796_v35 = vor.u32 %v2216_v31, %v1795_v30  ;;  %v2189_v37 = vld [vmem:[#allocation8 + $0x20] sm:$0xf0]  ;;  %v1783_v38 = vld [vmem:[#allocation8 + $0xd8] sm:$0xf]  ;;  %v1891_v42 = vld [vmem:[#allocation8 + $0x1b0] sm:$0xf] }
  0x3d   :  { %1114 = vmatpush.bf16.msrb.mxu3 %v2048_v50  ;;  %v2213_v39 = vld [vmem:[#allocation8 + $0xe0] sm:$0xf0]  ;;  %v1688_v40 = vor.u32 %v2189_v37, %v1687_v36  ;;  %v2240_v43 = vld [vmem:[#allocation8 + $0x1b8] sm:$0xf0]  ;;  %v1987_v44 = vld [vmem:[#allocation8 + $0x270] sm:$0xf] }
  0x3e   :  { %1076 = vmatpush.bf16.msrb.mxu0 %v1748_v49  ;;  %v1784_v41 = vor.u32 %v2213_v39, %v1783_v38  ;;  %v1892_v45 = vor.u32 %v2240_v43, %v1891_v42  ;;  %v2264_v46 = vld [vmem:[#allocation8 + $0x278] sm:$0xf0]  ;;  %v1675_v48 = vld [vmem:[#allocation8] sm:$0xf]  ;;  %v2186_v49 = vld [vmem:[#allocation8 + $0x8] sm:$0xf0] }
  0x3f   :  { %1089 = vmatpush.bf16.msrb.mxu1 %v1844_v54  ;;  %v1988_v47 = vor.u32 %v2264_v46, %v1987_v44  ;;  %v1771_v50 = vld [vmem:[#allocation8 + $0xc0] sm:$0xf]  ;;  %v1676_v51 = vor.u32 %v2186_v49, %v1675_v48  ;;  %v2210_v52 = vld [vmem:[#allocation8 + $0xc8] sm:$0xf0]  ;;  %v1761_v54 = vld [vmem:[#allocation8 + $0xb4] sm:$0xf0] }
  0x40   :  { %1102 = vmatpush.bf16.msrb.mxu2 %v1940_v60  ;;  %v2206_v53 = vld [vmem:[#allocation8 + $0xac] sm:$0xf]  ;;  %v1772_v55 = vor.u32 %v2210_v52, %v1771_v50  ;;  %v1857_v58 = vld [vmem:[#allocation8 + $0x174] sm:$0xf0]  ;;  %v2237_v61 = vld [vmem:[#allocation8 + $0x1a0] sm:$0xf0] }
  0x41   :  { %1115 = vmatpush.bf16.msrb.mxu3 %v2036_v0  ;;  %v1764_v56 = vor.u32 %v2206_v53, %v1761_v54  ;;  %v2230_v57 = vld [vmem:[#allocation8 + $0x16c] sm:$0xf]  ;;  %v1879_v59 = vld [vmem:[#allocation8 + $0x198] sm:$0xf]  ;;  %v2203_v2 = vld [vmem:[#allocation8 + $0x94] sm:$0xf] }
  0x42   :  { %1077 = vmatpush.bf16.msrb.mxu0 %v1736_v63  ;;  %v1860_v60 = vor.u32 %v2230_v57, %v1857_v58  ;;  %v1975_v62 = vld [vmem:[#allocation8 + $0x258] sm:$0xf]  ;;  %v2261_v63 = vld [vmem:[#allocation8 + $0x260] sm:$0xf0]  ;;  %v1880_v0 = vor.u32 %v2237_v61, %v1879_v59  ;;  %v1749_v3 = vld [vmem:[#allocation8 + $0x9c] sm:$0xf0] }
  0x43   :  { %1090 = vmatpush.bf16.msrb.mxu1 %v1832_v4  ;;  %v1976_v1 = vor.u32 %v2261_v63, %v1975_v62  ;;  %v1752_v4 = vor.u32 %v2203_v2, %v1749_v3  ;;  %v2227_v5 = vld [vmem:[#allocation8 + $0x154] sm:$0xf]  ;;  %v1845_v6 = vld [vmem:[#allocation8 + $0x15c] sm:$0xf0]  ;;  %v2258_v11 = vld [vmem:[#allocation8 + $0x248] sm:$0xf0] }
  0x44   :  { %1103 = vmatpush.bf16.msrb.mxu2 %v1928_v8  ;;  %v1867_v7 = vld [vmem:[#allocation8 + $0x180] sm:$0xf]  ;;  %v1848_v8 = vor.u32 %v2227_v5, %v1845_v6  ;;  %v1953_v15 = vld [vmem:[#allocation8 + $0x234] sm:$0xf0]  ;;  %v2278_v16 = vld [vmem:[#allocation8 + $0x2ec] sm:$0xf] }
  0x45   :  { %1116 = vmatpush.bf16.msrb.mxu3 %v2024_v10  ;;  %v1963_v10 = vld [vmem:[#allocation8 + $0x240] sm:$0xf]  ;;  %v2049_v18 = vld [vmem:[#allocation8 + $0x2f4] sm:$0xf0]  ;;  %v2200_v19 = vld [vmem:[#allocation8 + $0x7c] sm:$0xf] }
  0x46   :  { %1078 = vmatpush.bf16.msrb.mxu0 %v1724_v9  ;;  %v2234_v9 = vld [vmem:[#allocation8 + $0x188] sm:$0xf0]  ;;  %v1964_v13 = vor.u32 %v2258_v11, %v1963_v10  ;;  %v2224_v23 = vld [vmem:[#allocation8 + $0x13c] sm:$0xf]  ;;  %v1833_v24 = vld [vmem:[#allocation8 + $0x144] sm:$0xf0] }
  0x47   :  { %1091 = vmatpush.bf16.msrb.mxu1 %v1820_v14  ;;  %v1868_v12 = vor.u32 %v2234_v9, %v1867_v7  ;;  %v2254_v14 = vld [vmem:[#allocation8 + $0x22c] sm:$0xf]  ;;  %v1836_v25 = vor.u32 %v2224_v23, %v1833_v24  ;;  %v1941_v27 = vld [vmem:[#allocation8 + $0x21c] sm:$0xf0]  ;;  %v2275_v28 = vld [vmem:[#allocation8 + $0x2d4] sm:$0xf] }
  0x48   :  { %1104 = vmatpush.bf16.msrb.mxu2 %v1916_v20  ;;  %v1956_v17 = vor.u32 %v2254_v14, %v1953_v15  ;;  %v1737_v20 = vld [vmem:[#allocation8 + $0x84] sm:$0xf0]  ;;  %v2037_v30 = vld [vmem:[#allocation8 + $0x2dc] sm:$0xf0]  ;;  %v1821_v36 = vld [vmem:[#allocation8 + $0x12c] sm:$0xf0] }
  0x49   :  { %1117 = vmatpush.bf16.msrb.mxu3 %v2012_v22  ;;  %v1740_v22 = vor.u32 %v2200_v19, %v1737_v20  ;;  %v2040_v31 = vor.u32 %v2275_v28, %v2037_v30  ;;  %v2248_v38 = vld [vmem:[#allocation8 + $0x1fc] sm:$0xf]  ;;  %v1929_v39 = vld [vmem:[#allocation8 + $0x204] sm:$0xf0]  ;;  %v2194_v43 = vld [vmem:[#allocation8 + $0x4c] sm:$0xf] }
  0x4a   :  { %1079 = vmatpush.bf16.msrb.mxu0 %v1712_v21  ;;  %v2052_v21 = vor.u32 %v2278_v16, %v2049_v18  ;;  %v2025_v42 = vld [vmem:[#allocation8 + $0x2c4] sm:$0xf0]  ;;  %v1713_v44 = vld [vmem:[#allocation8 + $0x54] sm:$0xf0]  ;;  %v2245_v49 = vld [vmem:[#allocation8 + $0x1e4] sm:$0xf] }
  0x4b   :  { %1092 = vmatpush.bf16.msrb.mxu1 %v1808_v26  ;;  %v2251_v26 = vld [vmem:[#allocation8 + $0x214] sm:$0xf]  ;;  %v1716_v46 = vor.u32 %v2194_v43, %v1713_v44  ;;  %v1809_v48 = vld [vmem:[#allocation8 + $0x114] sm:$0xf0]  ;;  %v2269_v52 = vld [vmem:[#allocation8 + $0x2a4] sm:$0xf] }
  0x4c   :  { %1105 = vmatpush.bf16.msrb.mxu2 %v1904_v32  ;;  %v1944_v29 = vor.u32 %v2251_v26, %v1941_v27  ;;  %v2197_v32 = vld [vmem:[#allocation8 + $0x64] sm:$0xf]  ;;  %v2013_v53 = vld [vmem:[#allocation8 + $0x2ac] sm:$0xf0]  ;;  %v2215_v57 = vld [vmem:[#allocation8 + $0xf4] sm:$0xf] }
  0x4d   :  { %1118 = vmatpush.bf16.msrb.mxu3 %v2000_v34  ;;  %v2221_v34 = vld [vmem:[#allocation8 + $0x124] sm:$0xf]  ;;  %v2016_v58 = vor.u32 %v2269_v52, %v2013_v53  ;;  %v2242_v61 = vld [vmem:[#allocation8 + $0x1cc] sm:$0xf]  ;;  %v1905_v62 = vld [vmem:[#allocation8 + $0x1d4] sm:$0xf0] }
  0x4e   :  { %1080 = vmatpush.bf16.msrb.mxu0 %v1700_v33  ;;  %v1725_v33 = vld [vmem:[#allocation8 + $0x6c] sm:$0xf0]  ;;  %v1824_v37 = vor.u32 %v2221_v34, %v1821_v36  ;;  %v2188_v2 = vld [vmem:[#allocation8 + $0x1c] sm:$0xf]  ;;  %v1689_v3 = vld [vmem:[#allocation8 + $0x24] sm:$0xf0]  ;;  %v1908_v6 = vor.u32 %v2242_v61, %v1905_v62 }
  0x4f   :  { %1093 = vmatpush.bf16.msrb.mxu1 %v1796_v35  ;;  %v1728_v35 = vor.u32 %v2197_v32, %v1725_v33  ;;  %v1785_v5 = vld [vmem:[#allocation8 + $0xe4] sm:$0xf0]  ;;  %v141_v7 = vld [vmem:[#allocation7] sm:$0xf]  ;;  %v1692_v9 = vor.u32 %v2188_v2, %v1689_v3  ;;  %v2239_v10 = vld [vmem:[#allocation8 + $0x1b4] sm:$0xf] }
  0x50   :  { %1106 = vmatpush.bf16.msrb.mxu2 %v1892_v45  ;;  %v1893_v11 = vld [vmem:[#allocation8 + $0x1bc] sm:$0xf0]  ;;  %v143_v15 = vperm.slane %v141_v7, 0  ;;  %v2185_v19 = vld [vmem:[#allocation8 + $0x4] sm:$0xf]  ;;  %s1531_s22 = sshll.u32 %s2513_s21, 4  ;;  %s1532_s22 = int_to_ptr.vmem [resolvable:$true] %s1531_s22 }
  0x51   :  { %1119 = vmatpush.bf16.msrb.mxu3 %v1988_v47  ;;  %v2218_v47 = vld [vmem:[#allocation8 + $0x10c] sm:$0xf]  ;;  %v1989_v14 = vld [vmem:[#allocation8 + $0x27c] sm:$0xf0]  ;;  %v1896_v16 = vor.u32 %v2239_v10, %v1893_v11  ;;  %v1677_v20 = vld [vmem:[#allocation8 + $0xc] sm:$0xf0] }
  0x52   :  { %1081 = vmatpush.bf16.msrb.mxu0 %v1688_v40  ;;  %v2272_v40 = vld [vmem:[#allocation8 + $0x2bc] sm:$0xf]  ;;  %v1812_v50 = vor.u32 %v2218_v47, %v1809_v48  ;;  %v1680_v23 = vor.u32 %v2185_v19, %v1677_v20  ;;  %v1773_v24 = vld [vmem:[#allocation8 + $0xcc] sm:$0xf0]  ;;  %v1881_v30 = vld [vmem:[#allocation8 + $0x1a4] sm:$0xf0] }
  0x53   :  { %1094 = vmatpush.bf16.msrb.mxu1 %v1784_v41  ;;  %v1932_v41 = vor.u32 %v2248_v38, %v1929_v39  ;;  %v2028_v45 = vor.u32 %v2272_v40, %v2025_v42  ;;  %v2236_v28 = vld [vmem:[#allocation8 + $0x19c] sm:$0xf]  ;;  %v1977_v32 = vld [vmem:[#allocation8 + $0x264] sm:$0xf0]  ;;  %v146_v39 = vperm.slane %v141_v7, 3 }
  0x54   :  { %1107 = vmatpush.bf16.msrb.mxu2 %v1880_v0  ;;  %v2266_v0 = vld [vmem:[#allocation8 + $0x28c] sm:$0xf]  ;;  %v1884_v34 = vor.u32 %v2236_v28, %v1881_v30  ;;  %v1869_v42 = vld [vmem:[#allocation8 + $0x18c] sm:$0xf0]  ;;  %v2232_v30 = vld [vmem:[#allocation8 + $0x178] sm:$0xf0] }
  0x55   :  { %1120 = vmatpush.bf16.msrb.mxu3 %v1976_v1  ;;  %v2001_v1 = vld [vmem:[#allocation8 + $0x294] sm:$0xf0]  ;;  %v1965_v47 = vld [vmem:[#allocation8 + $0x24c] sm:$0xf0] }
  0x56   :  { %1082 = vmatpush.bf16.msrb.mxu0 %v1676_v51  ;;  %v1917_v51 = vld [vmem:[#allocation8 + $0x1ec] sm:$0xf0] }
  0x57   :  { %1095 = vmatpush.bf16.msrb.mxu1 %v1772_v55  ;;  %v1920_v54 = vor.u32 %v2245_v49, %v1917_v51  ;;  %v2191_v55 = vld [vmem:[#allocation8 + $0x34] sm:$0xf]  ;;  %v1863_v28 = vld [vmem:[#allocation8 + $0x170] sm:$0xf] }
  0x58   :  { %1108 = vmatpush.bf16.msrb.mxu2 %v1868_v12 }
  0x59   :  { %1121 = vmatpush.bf16.msrb.mxu3 %v1964_v13  ;;  %v2263_v13 = vld [vmem:[#allocation8 + $0x274] sm:$0xf] }
  0x5a   :  { %1127 = vmatpush.bf16.msra.mxu0 %v1764_v56  ;;  %v1701_v56 = vld [vmem:[#allocation8 + $0x3c] sm:$0xf0]  ;;  %v1992_v18 = vor.u32 %v2263_v13, %v1989_v14  ;;  %v1827_v14 = vld [vmem:[#allocation8 + $0x128] sm:$0xf] }
  0x5b   :  { %1140 = vmatpush.bf16.msra.mxu1 %v1860_v60  ;;  %v1704_v59 = vor.u32 %v2191_v55, %v1701_v56  ;;  %v1797_v60 = vld [vmem:[#allocation8 + $0xfc] sm:$0xf0] }
  0x5c   :  { %1153 = vmatpush.bf16.msra.mxu2 %v1956_v17  ;;  %v1800_v63 = vor.u32 %v2215_v57, %v1797_v60  ;;  %v144_v17 = vperm.slane %v141_v7, 1 }
  0x5d   :  { %1166 = vmatpush.bf16.msra.mxu3 %v2052_v21  ;;  %v2209_v21 = vld [vmem:[#allocation8 + $0xc4] sm:$0xf] }
  0x5e   :  { %1128 = vmatpush.bf16.msra.mxu0 %v1752_v4  ;;  %v2212_v4 = vld [vmem:[#allocation8 + $0xdc] sm:$0xf]  ;;  %v1776_v27 = vor.u32 %v2209_v21, %v1773_v24 }
  0x5f   :  { %1141 = vmatpush.bf16.msra.mxu1 %v1848_v8  ;;  %v2004_v8 = vor.u32 %v2266_v0, %v2001_v1  ;;  %v1788_v12 = vor.u32 %v2212_v4, %v1785_v5  ;;  %v2208_v24 = vld [vmem:[#allocation8 + $0xb8] sm:$0xf0] }
  0x60   :  { %1154 = vmatpush.bf16.msra.mxu2 %v1944_v29 }
  0x61   :  { %1167 = vmatpush.bf16.msra.mxu3 %v2040_v31  ;;  %v2260_v31 = vld [vmem:[#allocation8 + $0x25c] sm:$0xf] }
  0x62   :  { %1129 = vmatpush.bf16.msra.mxu0 %v1740_v22 }
  0x63   :  { %1142 = vmatpush.bf16.msra.mxu1 %v1836_v25 }
  0x64   :  { %1155 = vmatpush.bf16.msra.mxu2 %v1932_v41  ;;  %v2233_v41 = vld [vmem:[#allocation8 + $0x184] sm:$0xf] }
  0x65   :  { %1168 = vmatpush.bf16.msra.mxu3 %v2028_v45  ;;  %v1872_v45 = vor.u32 %v2233_v41, %v1869_v42  ;;  %v1851_v41 = vld [vmem:[#allocation8 + $0x158] sm:$0xf] }
  0x66   :  { %1130 = vmatpush.bf16.msra.mxu0 %v1728_v35  ;;  %v1980_v35 = vor.u32 %v2260_v31, %v1977_v32 }
  0x67   :  { %1143 = vmatpush.bf16.msra.mxu1 %v1824_v37  ;;  %v145_v37 = vperm.slane %v141_v7, 2 }
  0x68   :  { %1156 = vmatpush.bf16.msra.mxu2 %v1920_v54 }
  0x69   :  { %1169 = vmatpush.bf16.msra.mxu3 %v2016_v58 }
  0x6a   :  { %1131 = vmatpush.bf16.msra.mxu0 %v1716_v46  ;;  %v2257_v46 = vld [vmem:[#allocation8 + $0x244] sm:$0xf] }
  0x6b   :  { %1144 = vmatpush.bf16.msra.mxu1 %v1812_v50  ;;  %v1968_v52 = vor.u32 %v2257_v46, %v1965_v47  ;;  %v2256_v46 = vld [vmem:[#allocation8 + $0x238] sm:$0xf0] }
  0x6c   :  { %1157 = vmatpush.bf16.msra.mxu2 %v1908_v6 }
  0x6d   :  { %1170 = vmatpush.bf16.msra.mxu3 %v2004_v8 }
  0x6e   :  { %1132 = vmatpush.bf16.msra.mxu0 %v1704_v59 }
  0x6f   :  { %1145 = vmatpush.bf16.msra.mxu1 %v1800_v63 }
  0x70   :  { %1158 = vmatpush.bf16.msra.mxu2 %v1896_v16  ;;  %v1767_v16 = vld [vmem:[#allocation8 + $0xb0] sm:$0xf] }
  0x71   :  { %1171 = vmatpush.bf16.msra.mxu3 %v1992_v18 }
  0x72   :  { %1133 = vmatpush.bf16.msra.mxu0 %v1692_v9 }
  0x73   :  { %1146 = vmatpush.bf16.msra.mxu1 %v1788_v12 }
  0x74   :  { %1159 = vmatpush.bf16.msra.mxu2 %v1884_v34 }
  0x75   :  { %1172 = vmatpush.bf16.msra.mxu3 %v1980_v35 }
  0x76   :  { %1134 = vmatpush.bf16.msra.mxu0 %v1680_v23 }
  0x77   :  { %1147 = vmatpush.bf16.msra.mxu1 %v1776_v27 }
  0x78   :  { %1160 = vmatpush.bf16.msra.mxu2 %v1872_v45  ;;  %v1959_v45 = vld [vmem:[#allocation8 + $0x230] sm:$0xf] }
  0x79   :  { %1173 = vmatpush.bf16.msra.mxu3 %v1968_v52  ;;  %v2055_v52 = vld [vmem:[#allocation8 + $0x2f0] sm:$0xf] }
  0xb6   :  { %v320_v22 = vpop.f32.mrf.mxu0 }
  0xb7   :  { %v2579_v25 = vadd.f32 %v320_v22, %v143_v15  ;;  %v333_v26 = vpop.f32.mrf.mxu1 }
  0xb8   :  { %v2581_v29 = vadd.f32 %v333_v26, %v144_v17 }
  0xb9   :  { %v367_v33 = vand.u32 2147483647, %v2579_v25  ;;  %v363_v22 = vmax.f32 %v2579_v25, 0.0 }
  0xba   :  { %v368_v36 = vand.u32 2147483647, %v2581_v29  ;;  %v364_v26 = vmax.f32 %v2581_v29, 0.0 }
  0xbb   :  { %v371_v38 = vsub.f32 0.0, %v367_v33  ;;  %v1755_v33 = vld [vmem:[#allocation8 + $0x98] sm:$0xf] }
  0xbc   :  { %v372_v40 = vsub.f32 0.0, %v368_v36  ;;  %v1768_v36 = vor.u32 %v2208_v24, %v1767_v16  ;;  %v1719_v24 = vld [vmem:[#allocation8 + $0x50] sm:$0xf] }
  0xbd   :  { %v375_v43 = vmul.f32 1.442695, %v371_v38 }
  0xbe   :  { %v346_v44 = vpop.f32.mrf.mxu2  ;;  %v377_v48 = vmul.f32 1.442695, %v372_v40  ;;  %v322_v51 = vpop.f32.mrf.mxu0  ;;  %v1864_v40 = vor.u32 %v2232_v30, %v1863_v28  ;;  %v2220_v28 = vld [vmem:[#allocation8 + $0x118] sm:$0xf0] }
  0xbf   :  { %v2585_v49 = vadd.f32 %v346_v44, %v145_v37  ;;  %v359_v50 = vpop.f32.mrf.mxu3  ;;  %2320 = vpow2.f32 %v375_v43  ;;  %v335_v54 = vpop.f32.mrf.mxu1  ;;  %v2205_v37 = vld [vmem:[#allocation8 + $0xa0] sm:$0xf0] }
  0xc0   :  { %v2587_v53 = vadd.f32 %v359_v50, %v146_v39  ;;  %2322 = vpow2.f32 %v377_v48  ;;  %v2229_v44 = vld [vmem:[#allocation8 + $0x160] sm:$0xf0]  ;;  %v1756_v48 = vor.u32 %v2205_v37, %v1755_v33  ;;  %v2280_v54 = vld [vmem:[#allocation8 + $0x2f8] sm:$0xf0]  ;;  %v2247_v33 = vld [vmem:[#allocation8 + $0x1f0] sm:$0xf0] }
  0xc1   :  { %v369_v55 = vand.u32 2147483647, %v2585_v49  ;;  %v2271_v37 = vld [vmem:[#allocation8 + $0x2b0] sm:$0xf0] }
  0xc2   :  { %v370_v56 = vand.u32 2147483647, %v2587_v53 }
  0xc3   :  { %v373_v57 = vsub.f32 0.0, %v369_v55  ;;  %v1743_v55 = vld [vmem:[#allocation8 + $0x80] sm:$0xf] }
  0xc4   :  { %v374_v58 = vsub.f32 0.0, %v370_v56  ;;  %v365_v56 = vmax.f32 %v2585_v49, 0.0 }
  0xc5   :  { %v379_v59 = vmul.f32 1.442695, %v373_v57  ;;  %v2321_v60 = vpop.eup %2320 }
  0xc6   :  { %v381_v61 = vmul.f32 1.442695, %v374_v58  ;;  %v348_v62 = vpop.f32.mrf.mxu2  ;;  %v2323_v63 = vpop.eup %2322  ;;  %v383_v1 = vadd.f32 1.0, %v2321_v60  ;;  %v386_v2 = vmul.f32 -0.5, %v2321_v60  ;;  %v389_v6 = vand.u32 2147483647, %v2321_v60 }
  0xc7   :  { %2324 = vpow2.f32 %v379_v59  ;;  %v361_v0 = vpop.f32.mrf.mxu3  ;;  %v392_v3 = vadd.f32 1.0, %v2323_v63  ;;  %v395_v4 = vmul.f32 -0.5, %v2323_v63  ;;  %v398_v8 = vand.u32 2147483647, %v2323_v63  ;;  %v2202_v62 = vld [vmem:[#allocation8 + $0x88] sm:$0xf0] }
  0xc8   :  { %2326 = vpow2.f32 %v381_v61  ;;  %v387_v5 = vadd.f32 1.0, %v386_v2  ;;  %vm2591_vm0 = vcmp.lt.f32.partialorder %v389_v6, 0.0004427343  ;;  %v366_v59 = vmax.f32 %v2587_v53, 0.0  ;;  %v2226_v2 = vld [vmem:[#allocation8 + $0x148] sm:$0xf0] }
  0xc9   :  { %2328 = vlog2.f32 %v383_v1  ;;  %v396_v7 = vadd.f32 1.0, %v395_v4  ;;  %vm399_vm1 = vcmp.lt.f32.partialorder %v398_v8, 0.0004427343  ;;  %v1839_v1 = vld [vmem:[#allocation8 + $0x140] sm:$0xf]  ;;  %v1960_v4 = vor.u32 %v2256_v46, %v1959_v45 }
  0xca   :  { %2330 = vlog2.f32 %v392_v3  ;;  %v388_v11 = vmul.f32 %v2321_v60, %v387_v5  ;;  %v1852_v60 = vor.u32 %v2229_v44, %v1851_v41  ;;  %v2056_v5 = vor.u32 %v2280_v54, %v2055_v52  ;;  %v2253_v8 = vld [vmem:[#allocation8 + $0x220] sm:$0xf0]  ;;  %v1911_v44 = vld [vmem:[#allocation8 + $0x1d0] sm:$0xf]  ;;  %v2244_v45 = vld [vmem:[#allocation8 + $0x1d8] sm:$0xf0] }
  0xcb   :  { %v397_v15 = vmul.f32 %v2323_v63, %v396_v7  ;;  %v1744_v6 = vor.u32 %v2202_v62, %v1743_v55  ;;  %v1947_v7 = vld [vmem:[#allocation8 + $0x218] sm:$0xf]  ;;  %v2217_v41 = vld [vmem:[#allocation8 + $0x100] sm:$0xf0]  ;;  %v2190_v52 = vld [vmem:[#allocation8 + $0x28] sm:$0xf0] }
  0xcc   :  { %v1948_v16 = vor.u32 %v2253_v8, %v1947_v7  ;;  %v1791_v54 = vld [vmem:[#allocation8 + $0xe0] sm:$0xf]  ;;  %v2214_v55 = vld [vmem:[#allocation8 + $0xe8] sm:$0xf0]  ;;  %v1995_v62 = vld [vmem:[#allocation8 + $0x278] sm:$0xf] }
  0xcd   :  { %v2325_v9 = vpop.eup %2324  ;;  %v2238_v7 = vld [vmem:[#allocation8 + $0x1a8] sm:$0xf0] }
  0xce   :  { %v2327_v10 = vpop.eup %2326  ;;  %v401_v12 = vadd.f32 1.0, %v2325_v9  ;;  %v404_v17 = vmul.f32 -0.5, %v2325_v9  ;;  %v407_v38 = vand.u32 2147483647, %v2325_v9 }
  0xcf   :  { %v2329_v13 = vpop.eup %2328  ;;  %v410_v18 = vadd.f32 1.0, %v2327_v10  ;;  %v413_v21 = vmul.f32 -0.5, %v2327_v10  ;;  %v416_v42 = vand.u32 2147483647, %v2327_v10 }
  0xd0   :  { %v2331_v19 = vpop.eup %2330  ;;  %v385_v20 = vmul.f32 0.6931472, %v2329_v13  ;;  %2332 = vlog2.f32 %v401_v12  ;;  %v405_v34 = vadd.f32 1.0, %v404_v17  ;;  %vm408_vm2 = vcmp.lt.f32.partialorder %v407_v38, 0.0004427343 }
  0xd1   :  { %v394_v23 = vmul.f32 0.6931472, %v2331_v19  ;;  %2334 = vlog2.f32 %v410_v18  ;;  %v414_v39 = vadd.f32 1.0, %v413_v21  ;;  %vm417_vm3 = vcmp.lt.f32.partialorder %v416_v42, 0.0004427343 }
  0xd2   :  { %v391_v27 = vsel %vm2591_vm0, %v388_v11, %v385_v20  ;;  %v406_v51 = vmul.f32 %v2325_v9, %v405_v34  ;;  %v2043_v9 = vld [vmem:[#allocation8 + $0x2d8] sm:$0xf]  ;;  %v2277_v11 = vld [vmem:[#allocation8 + $0x2e0] sm:$0xf0]  ;;  %v1731_v12 = vld [vmem:[#allocation8 + $0x68] sm:$0xf] }
  0xd3   :  { %v419_v31 = vadd.f32 %v391_v27, %v363_v22  ;;  %v400_v32 = vsel %vm399_vm1, %v397_v15, %v394_v23  ;;  %v415_v58 = vmul.f32 %v2327_v10, %v414_v39  ;;  %v1840_v10 = vor.u32 %v2226_v2, %v1839_v1  ;;  %v2199_v13 = vld [vmem:[#allocation8 + $0x70] sm:$0xf0]  ;;  %v1935_v19 = vld [vmem:[#allocation8 + $0x200] sm:$0xf]  ;;  %v2250_v20 = vld [vmem:[#allocation8 + $0x208] sm:$0xf0] }
  0xd4   :  { %v420_v35 = vadd.f32 %v400_v32, %v364_v26  ;;  %v2223_v15 = vld [vmem:[#allocation8 + $0x130] sm:$0xf0]  ;;  %v2044_v17 = vor.u32 %v2277_v11, %v2043_v9  ;;  %v1732_v18 = vor.u32 %v2199_v13, %v1731_v12  ;;  %v2031_v22 = vld [vmem:[#allocation8 + $0x2c0] sm:$0xf]  ;;  %v2274_v23 = vld [vmem:[#allocation8 + $0x2c8] sm:$0xf0]  ;;  %v1936_v30 = vor.u32 %v2250_v20, %v1935_v19 }
  0xd5   :  { %v2599_v25 = vpack.c.bf16 %v419_v31, %v419_v31  ;;  %v1828_v21 = vor.u32 %v2223_v15, %v1827_v14  ;;  %v2196_v26 = vld [vmem:[#allocation8 + $0x58] sm:$0xf0]  ;;  %v1815_v27 = vld [vmem:[#allocation8 + $0x110] sm:$0xf]  ;;  %v2032_v31 = vor.u32 %v2274_v23, %v2031_v22  ;;  %v1923_v32 = vld [vmem:[#allocation8 + $0x1e8] sm:$0xf] }
  0xd6   :  { %v2333_v29 = vpop.eup %2332  ;;  %v2601_v43 = vpack.c.bf16 %v420_v35, %v420_v35  ;;  %v1720_v34 = vor.u32 %v2196_v26, %v1719_v24  ;;  %v1816_v35 = vor.u32 %v2220_v28, %v1815_v27  ;;  %v1707_v38 = vld [vmem:[#allocation8 + $0x38] sm:$0xf]  ;;  %v2193_v39 = vld [vmem:[#allocation8 + $0x40] sm:$0xf0]  ;;  %v1924_v42 = vor.u32 %v2247_v33, %v1923_v32  ;;  %v2187_v1 = vld [vmem:[#allocation8 + $0x10] sm:$0xf0] }
  0xd7   :  { %v2335_v47 = vpop.eup %2334  ;;  %1083 = vmatmul.bf16.vlgmr.msrb.gmra.mxu0 %v2599_v25  ;;  %v403_v50 = vmul.f32 0.6931472, %v2333_v29  ;;  %v1708_v46 = vor.u32 %v2193_v39, %v1707_v38  ;;  %v1779_v2 = vld [vmem:[#allocation8 + $0xc8] sm:$0xf]  ;;  %v2262_v11 = vld [vmem:[#allocation8 + $0x268] sm:$0xf0] }
  0xd8   :  { %1096 = vmatmul.bf16.vlgmr.msrb.gmra.mxu1 %v2601_v43  ;;  %1179 = vmatpush.bf16.msrb.mxu0 %v1768_v36  ;;  %v412_v57 = vmul.f32 0.6931472, %v2335_v47  ;;  %v2019_v36 = vld [vmem:[#allocation8 + $0x2a8] sm:$0xf]  ;;  %v2235_v15 = vld [vmem:[#allocation8 + $0x190] sm:$0xf0] }
  0xd9   :  { %1192 = vmatpush.bf16.msrb.mxu1 %v1864_v40  ;;  %v409_v61 = vsel %vm408_vm2, %v406_v51, %v403_v50  ;;  %v1803_v40 = vld [vmem:[#allocation8 + $0xf8] sm:$0xf]  ;;  %v2020_v29 = vor.u32 %v2271_v37, %v2019_v36  ;;  %v2268_v50 = vld [vmem:[#allocation8 + $0x298] sm:$0xf0]  ;;  %v1695_v51 = vld [vmem:[#allocation8 + $0x20] sm:$0xf] }
  0xda   :  { %v421_v63 = vadd.f32 %v409_v61, %v365_v56  ;;  %v418_v0 = vsel %vm417_vm3, %v415_v58, %v412_v57  ;;  %v1804_v47 = vor.u32 %v2217_v41, %v1803_v40  ;;  %v1912_v56 = vor.u32 %v2244_v45, %v1911_v44  ;;  %v1899_v58 = vld [vmem:[#allocation8 + $0x1b8] sm:$0xf]  ;;  %v1875_v14 = vld [vmem:[#allocation8 + $0x188] sm:$0xf]  ;;  %v2285_v23 = vld [vmem:[#allocation10 + $0x20] sm:$0xff] }
  0xdb   :  { %v422_v3 = vadd.f32 %v418_v0, %v366_v59  ;;  %v2241_v59 = vld [vmem:[#allocation8 + $0x1c0] sm:$0xf0]  ;;  %v1792_v61 = vor.u32 %v2214_v55, %v1791_v54  ;;  %v1683_v0 = vld [vmem:[#allocation8 + $0x8] sm:$0xf]  ;;  %v2288_v20 = vld [vmem:[#allocation10 + $0x38] sm:$0xff] }
  0xdc   :  { %1180 = vmatpush.bf16.msrb.mxu0 %v1756_v48  ;;  %v2607_v49 = vpack.c.bf16 %v421_v63, %v421_v63  ;;  %v2007_v48 = vld [vmem:[#allocation8 + $0x290] sm:$0xf]  ;;  %v2265_v63 = vld [vmem:[#allocation8 + $0x280] sm:$0xf0]  ;;  %v1684_v8 = vor.u32 %v2187_v1, %v1683_v0  ;;  %v2286_v22 = vld [vmem:[#allocation10 + $0x28] sm:$0xff] }
  0xdd   :  { %1193 = vmatpush.bf16.msrb.mxu1 %v1852_v60  ;;  %v2609_v53 = vpack.c.bf16 %v422_v3, %v422_v3  ;;  %v2008_v57 = vor.u32 %v2268_v50, %v2007_v48  ;;  %v1696_v60 = vor.u32 %v2190_v52, %v1695_v51  ;;  %v2211_v3 = vld [vmem:[#allocation8 + $0xd0] sm:$0xf0]  ;;  %v2284_v24 = vld [vmem:[#allocation10 + $0x18] sm:$0xff]  ;;  %v2293_v36 = vld [vmem:[#allocation10 + $0x60] sm:$0xff] }
  0xde   :  { %1109 = vmatmul.bf16.vlgmr.msrb.gmra.mxu2 %v2607_v49  ;;  %v1780_v9 = vor.u32 %v2211_v3, %v1779_v2  ;;  %v2296_v26 = vld [vmem:[#allocation10 + $0x78] sm:$0xff]  ;;  %v2303_v48 = vld [vmem:[#allocation10 + $0xb0] sm:$0xff] }
  0xdf   :  { %1122 = vmatmul.bf16.vlgmr.msrb.gmra.mxu3 %v2609_v53  ;;  %1205 = vmatpush.bf16.msrb.mxu2 %v1960_v4  ;;  %v1900_v4 = vor.u32 %v2241_v59, %v1899_v58  ;;  %v2292_v41 = vld [vmem:[#allocation10 + $0x58] sm:$0xff] }
  0xe0   :  { %1218 = vmatpush.bf16.msrb.mxu3 %v2056_v5  ;;  %1181 = vmatpush.bf16.msrb.mxu0 %v1744_v6  ;;  %v1996_v5 = vor.u32 %v2265_v63, %v1995_v62  ;;  %v1887_v6 = vld [vmem:[#allocation8 + $0x1a0] sm:$0xf] }
  0xe1   :  { %1194 = vmatpush.bf16.msrb.mxu1 %v1840_v10  ;;  %v1983_v10 = vld [vmem:[#allocation8 + $0x260] sm:$0xf]  ;;  %v1888_v12 = vor.u32 %v2238_v7, %v1887_v6 }
  0xe2   :  { %v1984_v13 = vor.u32 %v2262_v11, %v1983_v10  ;;  %v2301_v62 = vld [vmem:[#allocation10 + $0xa0] sm:$0xff]  ;;  %v2299_v11 = vld [vmem:[#allocation10 + $0x90] sm:$0xff] }
  0xe3   :  { %1206 = vmatpush.bf16.msrb.mxu2 %v1948_v16  ;;  %v1971_v16 = vld [vmem:[#allocation8 + $0x248] sm:$0xf] }
  0xe4   :  { %1219 = vmatpush.bf16.msrb.mxu3 %v2044_v17  ;;  %1182 = vmatpush.bf16.msrb.mxu0 %v1732_v18  ;;  %v2259_v17 = vld [vmem:[#allocation8 + $0x250] sm:$0xf0]  ;;  %v1876_v18 = vor.u32 %v2235_v15, %v1875_v14 }
  0xe5   :  { %1195 = vmatpush.bf16.msrb.mxu1 %v1828_v21  ;;  %v1972_v19 = vor.u32 %v2259_v17, %v1971_v16  ;;  %v2287_v21 = vld [vmem:[#allocation10 + $0x30] sm:$0xff] }
  0xe7   :  { %1207 = vmatpush.bf16.msrb.mxu2 %v1936_v30  ;;  %1135 = vmatmul.bf16.vlgmr.msra.gmra.mxu0 %v2599_v25  ;;  %v2282_v30 = vld [vmem:[#allocation10 + $0x8] sm:$0xff] }
  0xe8   :  { %1220 = vmatpush.bf16.msrb.mxu3 %v2032_v31  ;;  %1148 = vmatmul.bf16.vlgmr.msra.gmra.mxu1 %v2601_v43  ;;  %v2294_v31 = vld [vmem:[#allocation10 + $0x68] sm:$0xff] }
  0xe9   :  { %1183 = vmatpush.bf16.msrb.mxu0 %v1720_v34  ;;  %1196 = vmatpush.bf16.msrb.mxu1 %v1816_v35  ;;  %v2281_v35 = vld [vmem:[#allocation10] sm:$0xff] }
  0xeb   :  { %1208 = vmatpush.bf16.msrb.mxu2 %v1924_v42  ;;  %v2304_v42 = vld [vmem:[#allocation10 + $0xb8] sm:$0xff] }
  0xec   :  { %1221 = vmatpush.bf16.msrb.mxu3 %v2020_v29 }
  0xed   :  { %1184 = vmatpush.bf16.msrb.mxu0 %v1708_v46  ;;  %1197 = vmatpush.bf16.msrb.mxu1 %v1804_v47  ;;  %v2291_v47 = vld [vmem:[#allocation10 + $0x50] sm:$0xff] }
  0xee   :  { %1161 = vmatmul.bf16.vlgmr.msra.gmra.mxu2 %v2607_v49 }
  0xef   :  { %1174 = vmatmul.bf16.vlgmr.msra.gmra.mxu3 %v2609_v53  ;;  %1209 = vmatpush.bf16.msrb.mxu2 %v1912_v56  ;;  %v2290_v56 = vld [vmem:[#allocation10 + $0x48] sm:$0xff] }
  0xf0   :  { %1222 = vmatpush.bf16.msrb.mxu3 %v2008_v57  ;;  %v2302_v57 = vld [vmem:[#allocation10 + $0xa8] sm:$0xff] }
  0xf1   :  { %1185 = vmatpush.bf16.msrb.mxu0 %v1696_v60  ;;  %1198 = vmatpush.bf16.msrb.mxu1 %v1792_v61  ;;  %v2289_v61 = vld [vmem:[#allocation10 + $0x40] sm:$0xff] }
  0xf3   :  { %1210 = vmatpush.bf16.msrb.mxu2 %v1900_v4 }
  0xf4   :  { %1223 = vmatpush.bf16.msrb.mxu3 %v1996_v5  ;;  %v2300_v5 = vld [vmem:[#allocation10 + $0x98] sm:$0xff] }
  0xf5   :  { %1186 = vmatpush.bf16.msrb.mxu0 %v1684_v8  ;;  %1199 = vmatpush.bf16.msrb.mxu1 %v1780_v9 }
  0xf7   :  { %1211 = vmatpush.bf16.msrb.mxu2 %v1888_v12 }
  0xf8   :  { %1224 = vmatpush.bf16.msrb.mxu3 %v1984_v13  ;;  %1187 = vmatmul.bf16.vlgmr.msrb.gmra.mxu0 %v2599_v25 }
  0xf9   :  { %1200 = vmatmul.bf16.vlgmr.msrb.gmra.mxu1 %v2601_v43  ;;  %1475 = vmatpush.bf16.msra.mxu0 %v2288_v20  ;;  %v2624_v43 = vld [vmem:[%s2649_s4] sm:$0x7]  ;;  %v2298_v20 = vld [vmem:[#allocation10 + $0x88] sm:$0xff] }
  0xfa   :  { %1488 = vmatpush.bf16.msra.mxu1 %v2296_v26  ;;  %v557_v28 = vperm.slane %v2624_v43, 0  ;;  %v558_v51 = vperm.slane %v2624_v43, 1  ;;  %v559_v14 = vperm.slane %v2624_v43, 2  ;;  %v2297_v43 = vld [vmem:[#allocation10 + $0x80] sm:$0xff] }
  0xfb   :  { %1212 = vmatpush.bf16.msrb.mxu2 %v1876_v18 }
  0xfc   :  { %1225 = vmatpush.bf16.msrb.mxu3 %v1972_v19 }
  0xfd   :  { %1476 = vmatpush.bf16.msra.mxu0 %v2287_v21 }
  0xfe   :  { %1213 = vmatmul.bf16.vlgmr.msrb.gmra.mxu2 %v2607_v49  ;;  %v2283_v49 = vld [vmem:[#allocation10 + $0x10] sm:$0xff] }
  0xff   :  { %1226 = vmatmul.bf16.vlgmr.msrb.gmra.mxu3 %v2609_v53  ;;  %v2295_v53 = vld [vmem:[#allocation10 + $0x70] sm:$0xff]  ;;  %1501 = vmatpush.bf16.msra.mxu2 %v2304_v42 }
 0x100   :  { %1489 = vmatpush.bf16.msra.mxu1 %v2295_v53 }
 0x101   :  { %1477 = vmatpush.bf16.msra.mxu0 %v2286_v22 }
 0x103   :  { %1502 = vmatpush.bf16.msra.mxu2 %v2303_v48 }
 0x104   :  { %1490 = vmatpush.bf16.msra.mxu1 %v2294_v31 }
 0x105   :  { %1478 = vmatpush.bf16.msra.mxu0 %v2285_v23 }
 0x107   :  { %1503 = vmatpush.bf16.msra.mxu2 %v2302_v57 }
 0x108   :  { %1491 = vmatpush.bf16.msra.mxu1 %v2293_v36 }
 0x109   :  { %1479 = vmatpush.bf16.msra.mxu0 %v2284_v24 }
 0x10b   :  { %1504 = vmatpush.bf16.msra.mxu2 %v2301_v62 }
 0x10c   :  { %1492 = vmatpush.bf16.msra.mxu1 %v2292_v41 }
 0x10d   :  { %1480 = vmatpush.bf16.msra.mxu0 %v2283_v49 }
 0x10f   :  { %1505 = vmatpush.bf16.msra.mxu2 %v2300_v5  ;;  %v2317_v5 = vld [vmem:[%s2651_s6] ss:$0 sm:$0xff]  ;;  %s1533_s6 = sshll.u32 %s2654_s9, 4  ;;  %s1534_s6 = int_to_ptr.hbm [resolvable:$true] %s1533_s6 }
 0x110   :  { %1493 = vmatpush.bf16.msra.mxu1 %v2291_v47 }
 0x111   :  { %1481 = vmatpush.bf16.msra.mxu0 %v2282_v30 }
 0x113   :  { %1506 = vmatpush.bf16.msra.mxu2 %v2299_v11 }
 0x114   :  { %1494 = vmatpush.bf16.msra.mxu1 %v2290_v56 }
 0x115   :  { %1482 = vmatpush.bf16.msra.mxu0 %v2281_v35 }
 0x117   :  { %1507 = vmatpush.bf16.msra.mxu2 %v2298_v20 }
 0x118   :  { %1495 = vmatpush.bf16.msra.mxu1 %v2289_v61 }
 0x11b   :  { %1508 = vmatpush.bf16.msra.mxu2 %v2297_v43 }
 0x154   :  { %v1084_v25 = vpop.f32.mrf.mxu0 }
 0x155   :  { %v1097_v27 = vpop.f32.mrf.mxu1  ;;  %v1085_v32 = vadd.f32 %v1084_v25, %v557_v28 }
 0x157   :  { %v1098_v37 = vadd.f32 %v1097_v27, %v1085_v32 }
 0x15c   :  { %v1086_v33 = vpop.f32.mrf.mxu0 }
 0x15d   :  { %v1099_v34 = vpop.f32.mrf.mxu1 }
 0x161   :  { %v1110_v38 = vpop.f32.mrf.mxu2 }
 0x162   :  { %v1111_v39 = vadd.f32 %v1110_v38, %v1098_v37  ;;  %v1123_v40 = vpop.f32.mrf.mxu3 }
 0x164   :  { %v2627_v29 = vadd.f32 %v1123_v40, %v1111_v39  ;;  %v1136_v44 = vpop.f32.mrf.mxu0 }
 0x165   :  { %v1149_v45 = vpop.f32.mrf.mxu1  ;;  %v1137_v58 = vadd.f32 %v1136_v44, %v558_v51 }
 0x166   :  { %v1234_v46 = vand.u32 2147483647, %v2627_v29  ;;  %v1231_v24 = vmax.f32 %v2627_v29, 0.0 }
 0x167   :  { %v1150_v63 = vadd.f32 %v1149_v45, %v1137_v58 }
 0x168   :  { %v1237_v50 = vsub.f32 0.0, %v1234_v46 }
 0x169   :  { %v1112_v52 = vpop.f32.mrf.mxu2 }
 0x16a   :  { %v1240_v54 = vmul.f32 1.442695, %v1237_v50  ;;  %v1125_v55 = vpop.f32.mrf.mxu3 }
 0x16c   :  { %2336 = vpow2.f32 %v1240_v54  ;;  %v1138_v59 = vpop.f32.mrf.mxu0 }
 0x16d   :  { %v1151_v60 = vpop.f32.mrf.mxu1 }
 0x171   :  { %v1162_v0 = vpop.f32.mrf.mxu2 }
 0x172   :  { %v2337_v1 = vpop.eup %2336  ;;  %v1163_v2 = vadd.f32 %v1162_v0, %v1150_v63  ;;  %v1175_v3 = vpop.f32.mrf.mxu3 }
 0x173   :  { %v1246_v4 = vadd.f32 1.0, %v2337_v1  ;;  %v1249_v6 = vmul.f32 -0.5, %v2337_v1  ;;  %v1252_v15 = vand.u32 2147483647, %v2337_v1 }
 0x174   :  { %v1176_v7 = vadd.f32 %v1175_v3, %v1163_v2 }
 0x175   :  { %2338 = vlog2.f32 %v1246_v4  ;;  %v1188_v8 = vpop.f32.mrf.mxu0  ;;  %v1250_v12 = vadd.f32 1.0, %v1249_v6  ;;  %vm1253_vm4 = vcmp.lt.f32.partialorder %v1252_v15, 0.0004427343 }
 0x176   :  { %v1235_v9 = vand.u32 2147483647, %v1176_v7  ;;  %v1201_v10 = vpop.f32.mrf.mxu1  ;;  %v1189_v23 = vadd.f32 %v1188_v8, %v559_v14  ;;  %v1232_v47 = vmax.f32 %v1176_v7, 0.0 }
 0x177   :  { %v1251_v22 = vmul.f32 %v2337_v1, %v1250_v12  ;;  %v2319_v12 = vld [vmem:[%s2652_s7] ss:$0 sm:$0xff] }
 0x178   :  { %v1238_v13 = vsub.f32 0.0, %v1235_v9  ;;  %v1202_v53 = vadd.f32 %v1201_v10, %v1189_v23  ;;  %v2318_v10 = vld [vmem:[%s2653_s8] ss:$0 sm:$0xff] }
 0x179   :  { %v1164_v16 = vpop.f32.mrf.mxu2 }
 0x17a   :  { %v1242_v17 = vmul.f32 1.442695, %v1238_v13  ;;  %v1177_v18 = vpop.f32.mrf.mxu3 }
 0x17b   :  { %v2339_v19 = vpop.eup %2338 }
 0x17c   :  { %v1248_v21 = vmul.f32 0.6931472, %v2339_v19  ;;  %2340 = vpow2.f32 %v1242_v17 }
 0x17d   :  { %v1190_v26 = vpop.f32.mrf.mxu0 }
 0x17e   :  { %v1254_v25 = vsel %vm1253_vm4, %v1251_v22, %v1248_v21  ;;  %v1203_v27 = vpop.f32.mrf.mxu1 }
 0x17f   :  { %v1273_v49 = vadd.f32 %v1254_v25, %v1231_v24 }
 0x181   :  { %v1276_v28 = vpack.c.bf16 %v1273_v49, %v1273_v49  ;;  %v1214_v30 = vpop.f32.mrf.mxu2 }
 0x182   :  { %v2341_v31 = vpop.eup %2340  ;;  %v1215_v32 = vadd.f32 %v1214_v30, %v1202_v53  ;;  %v1227_v33 = vpop.f32.mrf.mxu3 }
 0x183   :  { %v1255_v34 = vadd.f32 1.0, %v2341_v31  ;;  %1483 = vmatmul.bf16.vlgmr.msra.gmra.mxu0 %v1276_v28  ;;  %v1258_v35 = vmul.f32 -0.5, %v2341_v31  ;;  %v1261_v40 = vand.u32 2147483647, %v2341_v31 }
 0x184   :  { %v1228_v36 = vadd.f32 %v1227_v33, %v1215_v32 }
 0x185   :  { %2342 = vlog2.f32 %v1255_v34  ;;  %v1259_v38 = vadd.f32 1.0, %v1258_v35  ;;  %vm1262_vm5 = vcmp.lt.f32.partialorder %v1261_v40, 0.0004427343 }
 0x186   :  { %v1236_v37 = vand.u32 2147483647, %v1228_v36  ;;  %v1233_v61 = vmax.f32 %v1228_v36, 0.0 }
 0x187   :  { %v1260_v46 = vmul.f32 %v2341_v31, %v1259_v38 }
 0x188   :  { %v1239_v39 = vsub.f32 0.0, %v1236_v37 }
 0x189   :  { %v1216_v41 = vpop.f32.mrf.mxu2 }
 0x18a   :  { %v1244_v42 = vmul.f32 1.442695, %v1239_v39  ;;  %v1229_v29 = vpop.f32.mrf.mxu3 }
 0x18b   :  { %v2343_v44 = vpop.eup %2342 }
 0x18c   :  { %v1257_v45 = vmul.f32 0.6931472, %v2343_v44  ;;  %2344 = vpow2.f32 %v1244_v42 }
 0x18e   :  { %v1263_v48 = vsel %vm1262_vm5, %v1260_v46, %v1257_v45 }
 0x18f   :  { %v1274_v50 = vadd.f32 %v1263_v48, %v1232_v47 }
 0x191   :  { %v1277_v51 = vpack.c.bf16 %v1274_v50, %v1274_v50 }
 0x192   :  { %v2345_v52 = vpop.eup %2344 }
 0x193   :  { %v1264_v54 = vadd.f32 1.0, %v2345_v52  ;;  %1496 = vmatmul.bf16.vlgmr.msra.gmra.mxu1 %v1277_v51  ;;  %v1267_v55 = vmul.f32 -0.5, %v2345_v52  ;;  %v1270_v57 = vand.u32 2147483647, %v2345_v52 }
 0x195   :  { %2346 = vlog2.f32 %v1264_v54  ;;  %v1268_v56 = vadd.f32 1.0, %v1267_v55  ;;  %vm1271_vm6 = vcmp.lt.f32.partialorder %v1270_v57, 0.0004427343 }
 0x197   :  { %v1269_v60 = vmul.f32 %v2345_v52, %v1268_v56 }
 0x19b   :  { %v2347_v58 = vpop.eup %2346 }
 0x19c   :  { %v1266_v59 = vmul.f32 0.6931472, %v2347_v58 }
 0x19e   :  { %v1272_v62 = vsel %vm1271_vm6, %v1269_v60, %v1266_v59 }
 0x19f   :  { %v1275_v63 = vadd.f32 %v1272_v62, %v1233_v61 }
 0x1a1   :  { %v1278_v0 = vpack.c.bf16 %v1275_v63, %v1275_v63 }
 0x1a3   :  { %1509 = vmatmul.bf16.vlgmr.msra.gmra.mxu2 %v1278_v0 }
 0x200   :  { %v1484_v1 = vpop.f32.mrf.mxu0 }
 0x201   :  { %v1485_v6 = vadd.f32 %v2317_v5, %v1484_v1 }
 0x208   :  { %v1486_v2 = vpop.f32.mrf.mxu0 }
 0x210   :  { %v1497_v3 = vpop.f32.mrf.mxu1 }
 0x211   :  { %v1498_v7 = vadd.f32 %v1497_v3, %v1485_v6 }
 0x218   :  { %v1499_v4 = vpop.f32.mrf.mxu1 }
 0x226   :  { %v1510_v8 = vpop.f32.mrf.mxu2 }
 0x227   :  { %v1511_v9 = vadd.f32 %v1510_v8, %v1498_v7 }
 0x229   :  { %2348 = vtanh.f32 %v1511_v9 }
 0x22e   :  { %v1512_v11 = vpop.f32.mrf.mxu2 }
 0x22f   :  { %v2349_v13 = vpop.eup %2348 }
 0x230   :  { %v1520_v14 = vmul.f32 %v2349_v13, %v2318_v10 }
 0x232   :  { %v1524_v15 = vadd.f32 %v2319_v12, %v1520_v14 }
 0x234   :  { %1525 = vst [vmem:[#allocation11] sm:$0xff] %v1524_v15 }
 0x235   :  { %1536 = dma.vmem_to_hbm [thread:$0]  %s1532_s22, 128, %s1534_s6, [#allocation4]  }
 0x236   :  { %2500 = dma.done.wait [#allocation4], 128  }
 0x237   :  { %2501 = vsyncadd [#allocation4], 4294967168 }
 0x238   :  { %1541 = vsyncpa [#allocation3], 1 }
 0x239   :  { %1542 = vsyncpa [#allocation6], 1 }
 0x23a   :  { %1543 = vsyncpa [#allocation9], 1 }
 0x23b   :  { %1544 = vsyncpa [#allocation4], 1 }

</bundles_post_ra>
